<compile_context>
chip_gen: v7x
topology: tpu7x:2x2x1
jax: 0.10.0
libtpu: 0.0.40
codegen_flags: <defaults>
</compile_context>

<pallas_src>
import functools

import jax
import jax.numpy as jnp
from jax.experimental import pallas as pl
from jax.experimental.pallas import tpu as pltpu


# ------------------------------- helpers ----------------------------------- #

def _round_up(x, m):
    return ((x + m - 1) // m) * m


def _pick_tile(dim, candidates):
    """Largest candidate that evenly divides `dim` (candidates descending)."""
    for c in candidates:
        if dim >= c and dim % c == 0:
            return c
    return dim


def _vmem_limit_bytes():
    """Generation-aware scoped-VMEM limit (~3/4 of physical VMEM per core)."""
    cap = 64 * 1024 * 1024                      # conservative default (v7x)
    try:
        info = pltpu.get_tpu_info()
        cap = int(getattr(info, "vmem_capacity_bytes", cap))
    except Exception:
        pass
    cap = max(32 * 1024 * 1024, min(cap, 128 * 1024 * 1024))
    return int(cap * 3 // 4)                    # 96 MiB v5e/v6e, 48 MiB v7x


_VMEM_LIMIT_BYTES = _vmem_limit_bytes()
_VMEM_BUDGET = int(_VMEM_LIMIT_BYTES * 0.8)     # headroom for compiler scratch
_WPANEL_CAP_BYTES = 8 * 1024 * 1024             # per-layer streamed panel cap


# --------------------------- fused MLP kernel ------------------------------ #
# All (bf16) weights + biases resident in VMEM; grid over batch tiles only.

def _fused_mlp_kernel(*refs, n_layers):
    x_ref = refs[0]
    o_ref = refs[-1]
    params = refs[1:-1]
    h = x_ref[...]                               # f32 activations
    for i in range(n_layers):
        w = params[2 * i][...]                   # bf16 weight
        b = params[2 * i + 1][...]               # f32 bias (1, Np)
        h = jnp.dot(h.astype(jnp.bfloat16), w,
                    preferred_element_type=jnp.float32) + b
        if i < n_layers - 1:                     # ReLU on all but the last
            h = jnp.maximum(h, 0.0)
    o_ref[...] = h.astype(o_ref.dtype)


def _fused_mlp(x, padded_params, tm):
    """x: [Mp, F0p] f32 (padded). padded_params: list of (w bf16, b f32)."""
    Mp, F0p = x.shape
    n_layers = len(padded_params)
    FLp = padded_params[-1][0].shape[1]

    in_specs = [pl.BlockSpec((tm, F0p), lambda i: (i, 0))]
    flat_args = [x]
    flops = 0
    bytes_accessed = 4 * Mp * (F0p + FLp)
    for (w, b) in padded_params:
        in_specs.append(pl.BlockSpec(w.shape, lambda i: (0, 0)))
        in_specs.append(pl.BlockSpec(b.shape, lambda i: (0, 0)))
        flat_args.extend([w, b])
        flops += 2 * Mp * w.shape[0] * w.shape[1]
        bytes_accessed += 2 * w.size + 4 * b.size

    kernel = functools.partial(_fused_mlp_kernel, n_layers=n_layers)
    return pl.pallas_call(
        kernel,
        out_shape=jax.ShapeDtypeStruct((Mp, FLp), jnp.float32),
        grid_spec=pltpu.PrefetchScalarGridSpec(
            num_scalar_prefetch=0,
            grid=(Mp // tm,),
            in_specs=in_specs,
            out_specs=pl.BlockSpec((tm, FLp), lambda i: (i, 0)),
        ),
        compiler_params=pltpu.CompilerParams(
            dimension_semantics=("parallel",),
            vmem_limit_bytes=_VMEM_LIMIT_BYTES,
        ),
        cost_estimate=pl.CostEstimate(
            flops=flops, transcendentals=0, bytes_accessed=bytes_accessed),
    )(*flat_args)


# ------------------- weight-streaming fused MLP kernel --------------------- #
# Batch tile of activations resident in VMEM across all layers (bf16 ping-pong
# buffers); each layer's weight streamed from HBM in double-buffered (Kp, tn)
# column panels with manual DMA.  No HBM activation round-trips.

def _streamed_mlp_kernel(*refs, layer_meta, n_layers, F0p, tm):
    x_ref = refs[0]
    params = refs[1:1 + 2 * n_layers]            # (w_hbm, b_vmem) per layer
    o_ref = refs[1 + 2 * n_layers]
    hbuf = refs[2 + 2 * n_layers]                # (2, tm, maxW) bf16 ping-pong
    sem = refs[3 + 2 * n_layers]                 # DMA semaphores (2,)
    wbufs = refs[4 + 2 * n_layers:]              # per-layer (2, Kp, tn) bf16

    # Load this batch tile of activations into VMEM once (bf16 for the MXU).
    hbuf[0, :, :F0p] = x_ref[...].astype(jnp.bfloat16)

    for l in range(n_layers):
        Kp, Np, tn, tkk = layer_meta[l]
        w_hbm = params[2 * l]
        b_ref = params[2 * l + 1]
        wbuf = wbufs[l]
        src_slot = l % 2
        dst_slot = 1 - src_slot
        last_layer = (l == n_layers - 1)
        nn = Np // tn
        nkk = Kp // tkk

        def w_copy(n, slot, w_hbm=w_hbm, wbuf=wbuf, tn=tn):
            return pltpu.make_async_copy(
                w_hbm.at[:, n * tn:(n + 1) * tn], wbuf.at[slot], sem.at[slot])

        w_copy(0, 0).start()                     # prime panel 0
        for n in range(nn):                      # static unroll over N panels
            slot = n % 2
            if n + 1 < nn:                       # prefetch next panel (overlap)
                w_copy(n + 1, 1 - slot).start()
            w_copy(n, slot).wait()

            acc = jnp.zeros((tm, tn), jnp.float32)
            for kc in range(nkk):                # bounded-size MXU operands
                acc = acc + jnp.dot(
                    hbuf[src_slot, :, kc * tkk:(kc + 1) * tkk],
                    wbuf[slot, kc * tkk:(kc + 1) * tkk, :],
                    preferred_element_type=jnp.float32)

            y = acc + b_ref[:, n * tn:(n + 1) * tn]      # f32 epilogue
            if last_layer:
                o_ref[:, n * tn:(n + 1) * tn] = y.astype(o_ref.dtype)
            else:
                hbuf[dst_slot, :, n * tn:(n + 1) * tn] = jnp.maximum(
                    y, 0.0).astype(jnp.bfloat16)


def _streamed_mlp(x, padded_params, layer_meta, tm):
    Mp, F0p = x.shape
    n_layers = len(padded_params)
    FLp = padded_params[-1][0].shape[1]
    maxW = max([F0p] + [m[1] for m in layer_meta])

    in_specs = [pl.BlockSpec((tm, F0p), lambda i: (i, 0))]
    flat_args = [x]
    scratch = [pltpu.VMEM((2, tm, maxW), jnp.bfloat16),
               pltpu.SemaphoreType.DMA((2,))]
    flops = 0
    bytes_accessed = 4 * Mp * (F0p + FLp)
    for (w, b), (Kp, Np, tn, _tkk) in zip(padded_params, layer_meta):
        in_specs.append(pl.BlockSpec(memory_space=pl.ANY))   # weight in HBM
        in_specs.append(pl.BlockSpec(b.shape, lambda i: (0, 0)))
        flat_args.extend([w, b])
        scratch.append(pltpu.VMEM((2, Kp, tn), jnp.bfloat16))
        flops += 2 * Mp * Kp * Np
        bytes_accessed += 2 * w.size * (Mp // tm) + 4 * b.size

    kernel = functools.partial(_streamed_mlp_kernel, layer_meta=layer_meta,
                               n_layers=n_layers, F0p=F0p, tm=tm)
    return pl.pallas_call(
        kernel,
        out_shape=jax.ShapeDtypeStruct((Mp, FLp), jnp.float32),
        grid_spec=pltpu.PrefetchScalarGridSpec(
            num_scalar_prefetch=0,
            grid=(Mp // tm,),
            in_specs=in_specs,
            out_specs=pl.BlockSpec((tm, FLp), lambda i: (i, 0)),
            scratch_shapes=scratch,
        ),
        compiler_params=pltpu.CompilerParams(
            dimension_semantics=("parallel",),
            vmem_limit_bytes=_VMEM_LIMIT_BYTES,
        ),
        cost_estimate=pl.CostEstimate(
            flops=flops, transcendentals=0, bytes_accessed=bytes_accessed),
    )(*flat_args)


# ----------------------- per-layer tiled linear (last resort) -------------- #

def _tiled_linear_kernel(x_ref, w_ref, b_ref, o_ref, acc_ref, *, apply_relu):
    @pl.when(pl.program_id(2) == 0)
    def _():
        acc_ref[...] = jnp.zeros_like(acc_ref)

    acc_ref[...] += jnp.dot(x_ref[...].astype(jnp.bfloat16), w_ref[...],
                            preferred_element_type=jnp.float32)

    @pl.when(pl.program_id(2) == pl.num_programs(2) - 1)
    def _():
        y = acc_ref[...] + b_ref[...]          # (1, tn) bias broadcasts, f32
        if apply_relu:
            y = jnp.maximum(y, 0.0)
        o_ref[...] = y.astype(o_ref.dtype)


def _tiled_linear(x, w, b, *, apply_relu):
    """x: [Mp, Kp] f32, w: [Kp, Np] bf16, b: [1, Np] f32; all padded."""
    Mp, Kp = x.shape
    Np = w.shape[1]
    tm = _pick_tile(Mp, (512, 256, 128, 64, 32, 16, 8))
    tk = _pick_tile(Kp, (1024, 512, 256, 128))
    tn = _pick_tile(Np, (1024, 512, 256, 128))

    def footprint(tm_, tk_, tn_):
        return (2 * tm_ * tk_ * 4 + 2 * tk_ * tn_ * 2 + 2 * tn_ * 4
                + 2 * tm_ * tn_ * 4 + tm_ * tn_ * 4)

    while footprint(tm, tk, tn) > _VMEM_BUDGET and max(tk, tn) > 128:
        if tk >= tn:
            tk //= 2
        else:
            tn //= 2

    grid = (Mp // tm, Np // tn, Kp // tk)
    kernel = functools.partial(_tiled_linear_kernel, apply_relu=apply_relu)
    flops = 2 * Mp * Kp * Np
    bytes_accessed = (4 * Mp * Kp * grid[1] + 2 * Kp * Np * grid[0]
                      + 4 * Np + 4 * Mp * Np)
    return pl.pallas_call(
        kernel,
        out_shape=jax.ShapeDtypeStruct((Mp, Np), jnp.float32),
        grid_spec=pltpu.PrefetchScalarGridSpec(
            num_scalar_prefetch=0,
            grid=grid,
            in_specs=[
                pl.BlockSpec((tm, tk), lambda i, j, k: (i, k)),
                pl.BlockSpec((tk, tn), lambda i, j, k: (k, j)),
                pl.BlockSpec((1, tn), lambda i, j, k: (0, j)),
            ],
            out_specs=pl.BlockSpec((tm, tn), lambda i, j, k: (i, j)),
            scratch_shapes=[pltpu.VMEM((tm, tn), jnp.float32)],
        ),
        compiler_params=pltpu.CompilerParams(
            dimension_semantics=("parallel", "parallel", "arbitrary"),
            vmem_limit_bytes=_VMEM_LIMIT_BYTES,
        ),
        cost_estimate=pl.CostEstimate(
            flops=flops, transcendentals=0, bytes_accessed=bytes_accessed),
    )(x, w, b)


# --------------------------- Module equivalent ----------------------------- #

class NeuralNetwork:
    """JAX/Pallas port of the PyTorch generic fully-connected network."""

    def __init__(self, *layers, key=None, force_tiled=False,
                 force_streamed=False):
        assert len(layers) >= 2, "need at least (in_features, out_features)"
        if key is None:
            key = jax.random.PRNGKey(42)
        self.layer_sizes = tuple(int(l) for l in layers)
        self.force_tiled = force_tiled
        self.force_streamed = force_streamed
        self.params = []          # unpadded f32:  (w [fin, fout], b [1, fout])
        self.padded_params = []   # 128-padded:    (w bf16, b f32)
        for i in range(len(self.layer_sizes) - 1):
            fan_in, fan_out = self.layer_sizes[i], self.layer_sizes[i + 1]
            key, kw, kb = jax.random.split(key, 3)
            # Deterministic init mirroring nn.Linear's U(-1/sqrt(fan_in), ...)
            bound = 1.0 / (fan_in ** 0.5)
            w = jax.random.uniform(kw, (fan_in, fan_out), jnp.float32,
                                   minval=-bound, maxval=bound)
            b = jax.random.uniform(kb, (1, fan_out), jnp.float32,
                                   minval=-bound, maxval=bound)
            self.params.append((w, b))

            fin_p, fout_p = _round_up(fan_in, 128), _round_up(fan_out, 128)
            wp = jnp.zeros((fin_p, fout_p), jnp.bfloat16)
            wp = wp.at[:fan_in, :fan_out].set(w.astype(jnp.bfloat16))
            bp = jnp.zeros((1, fout_p), jnp.float32).at[:, :fan_out].set(b)
            self.padded_params.append((wp, bp))

    # --- VMEM planning -------------------------------------------------- #

    def _plan_fused(self, Mp, F0p, FLp):
        w_bytes = sum(2 * 2 * w.size for w, _ in self.padded_params)   # 2 bufs
        b_bytes = sum(2 * 4 * b.size for _, b in self.padded_params)
        maxW = max([F0p, FLp] + [w.shape[1] for w, _ in self.padded_params])
        for tm in (512, 256, 128, 64, 32, 16, 8):
            if Mp % tm:
                continue
            act_bytes = 2 * tm * F0p * 4 + 2 * tm * FLp * 4 + 4 * tm * maxW * 4
            if w_bytes + b_bytes + act_bytes <= _VMEM_BUDGET:
                # Prefer >= 2 grid steps so both v7x TensorCores get work.
                while Mp // tm < 2 and tm >= 16:
                    tm //= 2
                return tm
        return None

    def _plan_streamed(self, Mp, F0p, FLp):
        metas = []
        wbuf_bytes = 0
        for (w, _b) in self.padded_params:
            Kp, Np = w.shape
            tn = _pick_tile(Np, (512, 256, 128))
            while 2 * Kp * tn * 2 > _WPANEL_CAP_BYTES and tn > 128:
                tn //= 2
            tkk = _pick_tile(Kp, (2048, 1024, 512, 256, 128))
            metas.append((Kp, Np, tn, tkk))
            wbuf_bytes += 2 * Kp * tn * 2
        maxW = max([F0p] + [m[1] for m in metas])
        max_tn = max(m[2] for m in metas)
        b_bytes = sum(2 * 4 * b.size for _, b in self.padded_params)
        for tm in (256, 128, 64, 32, 16, 8):
            if Mp % tm:
                continue
            hb = 2 * tm * maxW * 2                       # bf16 ping-pong
            io = 2 * tm * F0p * 4 + 2 * tm * FLp * 4     # pipelined x / out
            tmp = 2 * tm * maxW * 2 + 2 * tm * max_tn * 4
            if wbuf_bytes + b_bytes + hb + io + tmp <= _VMEM_BUDGET:
                while Mp // tm < 2 and tm >= 16:
                    tm //= 2
                return tm, metas
        return None, metas

    # --- forward --------------------------------------------------------- #

    def _tiled_chain(self, hp):
        g = hp
        n = len(self.padded_params)
        for i, (wp, bp) in enumerate(self.padded_params):
            g = _tiled_linear(g, wp, bp, apply_relu=(i < n - 1))
        return g

    def __call__(self, x):
        # nn.Flatten(): keep batch dim, flatten the rest (row-major).
        B = x.shape[0]
        h = x.reshape(B, -1).astype(jnp.float32)
        F0 = h.shape[1]
        assert F0 == self.layer_sizes[0], "input features mismatch"

        F0p = _round_up(F0, 128)
        Mp = _round_up(B, 128) if B >= 128 else _round_up(B, 8)
        if (Mp, F0p) == (B, F0):
            hp = h                       # already aligned: skip the pad copy
        else:
            hp = jnp.zeros((Mp, F0p), jnp.float32).at[:B, :F0].set(h)
        FLp = self.padded_params[-1][0].shape[1]

        if self.force_tiled:
            out_p = self._tiled_chain(hp)
        else:
            tm_fused = (None if self.force_streamed
                        else self._plan_fused(Mp, F0p, FLp))
            if tm_fused is not None:
                out_p = _fused_mlp(hp, self.padded_params, tm_fused)
            else:
                tm_s, metas = self._plan_streamed(Mp, F0p, FLp)
                if tm_s is not None:
                    out_p = _streamed_mlp(hp, self.padded_params, metas, tm_s)
                else:
                    out_p = self._tiled_chain(hp)   # last resort

        return out_p[:B, :self.layer_sizes[-1]]


# --------------------------------- Main ------------------------------------ #

if __name__ == "__main__":
    key = jax.random.PRNGKey(0)
    # Small example: input [2, 4, 4, 4] -> 64 flattened features.
    x = jax.random.normal(key, (2, 4, 4, 4), dtype=jnp.float32)

    model = NeuralNetwork(64, 32, 10)   # 64 -> 32 -> 10 (ReLU between)
    logits = jax.block_until_ready(model(x))
    assert logits.shape == (2, 10)

    # Matched-precision reference: bf16 weights/activations at the dot,
    # f32 accumulation + f32 bias/ReLU (exactly the kernel's math).
    def ref_bf16(params, xin):
        hh = xin.reshape(xin.shape[0], -1).astype(jnp.float32)
        n = len(params)
        for i, (w, b) in enumerate(params):
            hh = jnp.dot(hh.astype(jnp.bfloat16), w.astype(jnp.bfloat16),
                         preferred_element_type=jnp.float32) + b
            if i < n - 1:
                hh = jnp.maximum(hh, 0.0)
        return hh

    ref = ref_bf16(model.params, x)
    assert jnp.allclose(logits, ref, atol=2e-3, rtol=2e-3), \
        float(jnp.max(jnp.abs(logits - ref)))

    # Loose check against the full-f32 reference (bf16 weight storage).
    h32 = x.reshape(2, -1)
    for i, (w, b) in enumerate(model.params):
        h32 = h32 @ w + b
        if i < len(model.params) - 1:
            h32 = jnp.maximum(h32, 0.0)
    assert jnp.allclose(logits, h32, atol=5e-2, rtol=5e-2), \
        float(jnp.max(jnp.abs(logits - h32)))

    # Also exercise the weight-streaming and per-layer tiled fallback paths
    # (same deterministic init => same reference).
    logits_s = jax.block_until_ready(
        NeuralNetwork(64, 32, 10, force_streamed=True)(x))
    assert jnp.allclose(logits_s, ref, atol=2e-3, rtol=2e-3)

    logits_t = jax.block_until_ready(
        NeuralNetwork(64, 32, 10, force_tiled=True)(x))
    assert jnp.allclose(logits_t, ref, atol=2e-3, rtol=2e-3)

    print("KERNEL_OK")
</pallas_src>

<mosaic_0001>
module attributes {stable_mosaic.version = 11 : i64} {
  func.func @_fused_mlp_kernel(%arg0: i32, %arg1: memref<8x128xf32, #tpu.memory_space<vmem>>, %arg2: memref<128x128xbf16, #tpu.memory_space<vmem>>, %arg3: memref<1x128xf32, #tpu.memory_space<vmem>>, %arg4: memref<128x128xbf16, #tpu.memory_space<vmem>>, %arg5: memref<1x128xf32, #tpu.memory_space<vmem>>, %arg6: memref<8x128xf32, #tpu.memory_space<vmem>>) attributes {dimension_semantics = [#tpu.dimension_semantics<parallel>], iteration_bounds = array<i64: 1>, scalar_prefetch = 0 : i64, scratch_operands = 0 : i64, tpu.core_type = #tpu.core_type<tc>, window_params = [{transform_indices = @transform_0, window_bounds = array<i64: 8, 128>}, {pipeline_mode = #tpu.pipeline_mode<synchronous>, transform_indices = @transform_1, window_bounds = array<i64: 128, 128>}, {pipeline_mode = #tpu.pipeline_mode<synchronous>, transform_indices = @transform_2, window_bounds = array<i64: 1, 128>}, {pipeline_mode = #tpu.pipeline_mode<synchronous>, transform_indices = @transform_3, window_bounds = array<i64: 128, 128>}, {pipeline_mode = #tpu.pipeline_mode<synchronous>, transform_indices = @transform_4, window_bounds = array<i64: 1, 128>}, {transform_indices = @transform_5, window_bounds = array<i64: 8, 128>}]} {
    %c0 = arith.constant 0 : index
    %c0_0 = arith.constant 0 : index
    %0 = vector.load %arg1[%c0, %c0_0] : memref<8x128xf32, #tpu.memory_space<vmem>>, vector<8x128xf32>
    %c0_1 = arith.constant 0 : index
    %c0_2 = arith.constant 0 : index
    %1 = vector.load %arg2[%c0_1, %c0_2] : memref<128x128xbf16, #tpu.memory_space<vmem>>, vector<128x128xbf16>
    %c0_3 = arith.constant 0 : index
    %c0_4 = arith.constant 0 : index
    %2 = vector.load %arg3[%c0_3, %c0_4] : memref<1x128xf32, #tpu.memory_space<vmem>>, vector<1x128xf32>
    %3 = arith.truncf %0 : vector<8x128xf32> to vector<8x128xbf16>
    %cst = arith.constant dense<0.000000e+00> : vector<8x128xf32>
    %4 = tpu.matmul %3, %1, %cst {dimension_numbers = #tpu.dot_dimension_numbers<[1], [0], [0], [1], [0, 0, 1, 1], [], []>} : vector<8x128xbf16>, vector<128x128xbf16>, vector<8x128xf32> -> vector<8x128xf32>
    %5 = vector.broadcast %2 : vector<1x128xf32> to vector<8x128xf32>
    %6 = arith.addf %4, %5 : vector<8x128xf32>
    %cst_5 = arith.constant 0.000000e+00 : f32
    %7 = vector.broadcast %cst_5 : f32 to vector<8x128xf32>
    %8 = arith.maximumf %6, %7 : vector<8x128xf32>
    %c0_6 = arith.constant 0 : index
    %c0_7 = arith.constant 0 : index
    %9 = vector.load %arg4[%c0_6, %c0_7] : memref<128x128xbf16, #tpu.memory_space<vmem>>, vector<128x128xbf16>
    %c0_8 = arith.constant 0 : index
    %c0_9 = arith.constant 0 : index
    %10 = vector.load %arg5[%c0_8, %c0_9] : memref<1x128xf32, #tpu.memory_space<vmem>>, vector<1x128xf32>
    %11 = arith.truncf %8 : vector<8x128xf32> to vector<8x128xbf16>
    %cst_10 = arith.constant dense<0.000000e+00> : vector<8x128xf32>
    %12 = tpu.matmul %11, %9, %cst_10 {dimension_numbers = #tpu.dot_dimension_numbers<[1], [0], [0], [1], [0, 0, 1, 1], [], []>} : vector<8x128xbf16>, vector<128x128xbf16>, vector<8x128xf32> -> vector<8x128xf32>
    %13 = vector.broadcast %10 : vector<1x128xf32> to vector<8x128xf32>
    %14 = arith.addf %12, %13 : vector<8x128xf32>
    %c0_11 = arith.constant 0 : index
    %c0_12 = arith.constant 0 : index
    %15 = vector.load %arg6[%c0_11, %c0_12] : memref<8x128xf32, #tpu.memory_space<vmem>>, vector<8x128xf32>
    tpu.vector_store %arg6[%c0_11, %c0_12], %14 {strides = array<i32>} : memref<8x128xf32, #tpu.memory_space<vmem>>, vector<8x128xf32>,
    return
  }
  func.func @transform_0(%arg0: i32) -> (i32, i32) {
    %c0_i32 = arith.constant 0 : i32
    %c0_i32_0 = arith.constant 0 : i32
    return %arg0, %c0_i32 : i32, i32
  }
  func.func @transform_1(%arg0: i32) -> (i32, i32) {
    %c0_i32 = arith.constant 0 : i32
    %c0_i32_0 = arith.constant 0 : i32
    %c0_i32_1 = arith.constant 0 : i32
    return %c0_i32, %c0_i32_0 : i32, i32
  }
  func.func @transform_2(%arg0: i32) -> (i32, i32) {
    %c0_i32 = arith.constant 0 : i32
    %c0_i32_0 = arith.constant 0 : i32
    %c0_i32_1 = arith.constant 0 : i32
    return %c0_i32, %c0_i32_0 : i32, i32
  }
  func.func @transform_3(%arg0: i32) -> (i32, i32) {
    %c0_i32 = arith.constant 0 : i32
    %c0_i32_0 = arith.constant 0 : i32
    %c0_i32_1 = arith.constant 0 : i32
    return %c0_i32, %c0_i32_0 : i32, i32
  }
  func.func @transform_4(%arg0: i32) -> (i32, i32) {
    %c0_i32 = arith.constant 0 : i32
    %c0_i32_0 = arith.constant 0 : i32
    %c0_i32_1 = arith.constant 0 : i32
    return %c0_i32, %c0_i32_0 : i32, i32
  }
  func.func @transform_5(%arg0: i32) -> (i32, i32) {
    %c0_i32 = arith.constant 0 : i32
    %c0_i32_0 = arith.constant 0 : i32
    return %arg0, %c0_i32 : i32, i32
  }
}

</mosaic_0001>

<bundles_post_ra>
// kernel: tpu_custom_call.1
= control target key start
LH: loop header
LB: loop body
LE: loop exit
PB: predicated region body
PF: predicated region fallthrough
CT: control target
= control target key end

     0   :  { %10 = vsyncpa [#allocation3], 0  ;;  %s596_s0 = inlined_call_operand.hbm [shape: f32[8,128], index: 0, kind: input, shape index: {}]   ;;  %s597_s1 = inlined_call_operand.hbm [shape: bf16[128,128], index: 1, kind: input, shape index: {}]   ;;  %s598_s2 = inlined_call_operand.vmem [shape: f32[1,128], index: 2, kind: input, shape index: {}]   ;;  %s599_s3 = inlined_call_operand.hbm [shape: bf16[128,128], index: 3, kind: input, shape index: {}]   ;;  %s600_s4 = inlined_call_operand.vmem [shape: f32[1,128], index: 4, kind: input, shape index: {}]   ;;  %s601_s5 = inlined_call_operand.hbm [shape: f32[8,128], index: 5, kind: output, shape index: {}]  }
   0x1   :  { %11 = vsyncpa [#allocation6], 0 }
   0x2   :  { %12 = vsyncpa [#allocation4], 0  ;;  %s498_s18 = smov [#allocation5]   ;;  %s404_s22 = scalar_lea.hbm %s597_s1, 1024 }
   0x3   :  { %s28_s19 = sshll.u32 %s498_s18, 4  ;;  %p405_p0 = scmp.ne.s32.totalorder %s597_s1, %s404_s22  ;;  %s29_s19 = int_to_ptr.vmem [resolvable:$true] %s28_s19 }
   0x4   :  { %p408_p1 = scmp.lt.u32.totalorder %s404_s22, %s597_s1 }
   0x6   :  { %p410_p2 = pnand %p408_p1, %p405_p0 }
   0x8   :  { %413 = shalt.err (!%p410_p2)
}
   0x9   :  { %s414_s27 = scalar_lea.vmem %s29_s19, 1024  ;;  %p419_p4 = scmp.lt.s32.totalorder %s29_s19, %s29_s19 }
   0xa   :  { %p415_p3 = scmp.ne.s32.totalorder %s29_s19, %s414_s27  ;;  %p420_p5 = scmp.lt.s32.totalorder %s414_s27, %s414_s27 }
   0xc   :  { %p421_p6 = por %p420_p5, %p419_p4 }
   0xe   :  { %p422_p7 = pnand %p421_p6, %p415_p3 }
  0x10   :  { %425 = shalt.err (!%p422_p7)
}
  0x11   :  { %s499_s28 = smov 64   ;;  %s500_s29 = smov 4  }
  0x12   :  { %34 = dma.hbm_to_vmem [thread:$0]  %s597_s1, 1024, %s29_s19, [#allocation6], %s499_s28, %s499_s28, %s500_s29  }
  0x13   :  { %s501_s7 = smov [#allocation2]   ;;  %s502_s9 = smov [#allocation7]  }
  0x14   :  { %s19_s8 = sshll.u32 %s501_s7, 4  ;;  %s42_s10 = sshll.u32 %s502_s9, 4  ;;  %s20_s8 = int_to_ptr.vmem [resolvable:$true] %s19_s8  ;;  %s43_s10 = int_to_ptr.vmem [resolvable:$true] %s42_s10 }
  0x15   :  { %s426_s13 = scalar_lea.hbm %s596_s0, 128 }
  0x16   :  { %p427_p8 = scmp.ne.s32.totalorder %s596_s0, %s426_s13  ;;  %p430_p9 = scmp.lt.u32.totalorder %s426_s13, %s596_s0 }
  0x18   :  { %p432_p10 = pnand %p430_p9, %p427_p8 }
  0x1a   :  { %435 = shalt.err (!%p432_p10)
}
  0x1b   :  { %s436_s1 = scalar_lea.vmem %s20_s8, 128  ;;  %p441_p12 = scmp.lt.s32.totalorder %s20_s8, %s20_s8 }
  0x1c   :  { %p437_p11 = scmp.ne.s32.totalorder %s20_s8, %s436_s1  ;;  %p442_p13 = scmp.lt.s32.totalorder %s436_s1, %s436_s1 }
  0x1e   :  { %p443_p0 = por %p442_p13, %p441_p12 }
  0x20   :  { %p444_p1 = pnand %p443_p0, %p437_p11 }
  0x22   :  { %447 = shalt.err (!%p444_p1)
}
  0x23   :  { %22 = dma.hbm_to_vmem [thread:$0]  %s596_s0, 128, %s20_s8, [#allocation3]  }
  0x24   :  { %s448_s22 = scalar_lea.hbm %s599_s3, 1024 }
  0x25   :  { %p449_p2 = scmp.ne.s32.totalorder %s599_s3, %s448_s22  ;;  %p452_p3 = scmp.lt.u32.totalorder %s448_s22, %s599_s3 }
  0x27   :  { %p454_p4 = pnand %p452_p3, %p449_p2 }
  0x29   :  { %457 = shalt.err (!%p454_p4)
}
  0x2a   :  { %s458_s27 = scalar_lea.vmem %s43_s10, 1024  ;;  %p463_p6 = scmp.lt.s32.totalorder %s43_s10, %s43_s10 }
  0x2b   :  { %p459_p5 = scmp.ne.s32.totalorder %s43_s10, %s458_s27  ;;  %p464_p7 = scmp.lt.s32.totalorder %s458_s27, %s458_s27 }
  0x2d   :  { %p465_p8 = por %p464_p7, %p463_p6 }
  0x2f   :  { %p466_p9 = pnand %p465_p8, %p459_p5 }
  0x31   :  { %469 = shalt.err (!%p466_p9)
}
  0x32   :  { %48 = dma.hbm_to_vmem [thread:$0]  %s599_s3, 1024, %s43_s10, [#allocation6], %s499_s28, %s499_s28, %s500_s29  }
  0x33   :  { %492 = dma.done.wait [#allocation3], 128  }
  0x34   :  { %493 = vsyncadd [#allocation3], 4294967168 }
  0x35   :  { %494 = dma.done.wait [#allocation6], 2048  }
  0x36   :  { %495 = vsyncadd [#allocation6], 4294965248  ;;  %v503_v0 = vmov 0.0   ;;  %vm504_vm0 = vmmov 0   ;;  %v388_v1 = vld [vmem:[#allocation5] sm:$0xff]   ;;  %v389_v2 = vld [vmem:[#allocation5 + $0x8] sm:$0xff]  }
  0x37   :  { %340 = vmatprep.subr.bf16.mxu0 %v503_v0  ;;  %356 = vmatprep.mubr.msk.bf16.mxu0 %vm504_vm0, %v503_v0  ;;  %v390_v3 = vld [vmem:[#allocation5 + $0x10] sm:$0xff]   ;;  %v396_v4 = vld [vmem:[#allocation7] sm:$0xff]   ;;  %v391_v5 = vld [vmem:[#allocation5 + $0x18] sm:$0xff]   ;;  %s505_s7 = smov [#allocation8]  }
  0x38   :  { %360 = vmatprep.subr.bf16.mxu1 %v503_v0  ;;  %376 = vmatprep.mubr.msk.bf16.mxu1 %vm504_vm0, %v503_v0  ;;  %v397_v6 = vld [vmem:[#allocation7 + $0x8] sm:$0xff]   ;;  %v392_v7 = vld [vmem:[#allocation5 + $0x20] sm:$0xff]   ;;  %v398_v8 = vld [vmem:[#allocation7 + $0x10] sm:$0xff]   ;;  %s294_s8 = sshll.u32 %s505_s7, 4  ;;  %s295_s8 = int_to_ptr.vmem [resolvable:$true] %s294_s8 }
  0x39   :  { %341 = vmatpush3.bf16.msra.mxu0 %v388_v1  ;;  %361 = vmatpush3.bf16.msra.mxu1 %v396_v4  ;;  %v393_v9 = vld [vmem:[#allocation5 + $0x28] sm:$0xff]   ;;  %v399_v10 = vld [vmem:[#allocation7 + $0x18] sm:$0xff]   ;;  %v394_v11 = vld [vmem:[#allocation5 + $0x30] sm:$0xff]   ;;  %p475_p11 = scmp.lt.s32.totalorder %s295_s8, %s295_s8 }
  0x3a   :  { %342 = vmatprep.subr.bf16.mxu0 %v503_v0  ;;  %362 = vmatprep.subr.bf16.mxu1 %v503_v0  ;;  %v400_v12 = vld [vmem:[#allocation7 + $0x20] sm:$0xff]   ;;  %v395_v13 = vld [vmem:[#allocation5 + $0x38] sm:$0xff]   ;;  %v401_v15 = vld [vmem:[#allocation7 + $0x28] sm:$0xff]  }
  0x3b   :  { %v61_v14 = vld [vmem:[#allocation2] sm:$0xff]  ;;  %v402_v17 = vld [vmem:[#allocation7 + $0x30] sm:$0xff]  }
  0x3c   :  { %v79_v16 = vpack.c.bf16 %v61_v14, %v61_v14  ;;  %v403_v18 = vld [vmem:[#allocation7 + $0x38] sm:$0xff]  }
  0x3d   :  { %343 = vmatpush3.bf16.msra.mxu0 %v389_v2  ;;  %363 = vmatpush3.bf16.msra.mxu1 %v397_v6  ;;  %v304_v19 = vld [vmem:[%s598_s2] ss:$0 sm:$0xff]  ;;  %s470_s2 = scalar_lea.vmem %s295_s8, 128 }
  0x3e   :  { %344 = vmatprep.subr.bf16.mxu0 %v503_v0  ;;  %364 = vmatprep.subr.bf16.mxu1 %v503_v0  ;;  %v313_v27 = vld [vmem:[%s600_s4] ss:$0 sm:$0xff]  ;;  %p471_p10 = scmp.ne.s32.totalorder %s295_s8, %s470_s2  ;;  %p476_p12 = scmp.lt.s32.totalorder %s470_s2, %s470_s2 }
  0x40   :  { %p477_p13 = por %p476_p12, %p475_p11 }
  0x41   :  { %345 = vmatpush3.bf16.msra.mxu0 %v390_v3  ;;  %365 = vmatpush3.bf16.msra.mxu1 %v398_v8 }
  0x42   :  { %346 = vmatprep.subr.bf16.mxu0 %v503_v0  ;;  %366 = vmatprep.subr.bf16.mxu1 %v503_v0  ;;  %p478_p0 = pnand %p477_p13, %p471_p10 }
  0x45   :  { %347 = vmatpush3.bf16.msra.mxu0 %v391_v5  ;;  %367 = vmatpush3.bf16.msra.mxu1 %v399_v10 }
  0x46   :  { %348 = vmatprep.subr.bf16.mxu0 %v503_v0  ;;  %368 = vmatprep.subr.bf16.mxu1 %v503_v0 }
  0x49   :  { %349 = vmatpush3.bf16.msra.mxu0 %v392_v7  ;;  %369 = vmatpush3.bf16.msra.mxu1 %v400_v12 }
  0x4a   :  { %350 = vmatprep.subr.bf16.mxu0 %v503_v0  ;;  %370 = vmatprep.subr.bf16.mxu1 %v503_v0 }
  0x4d   :  { %351 = vmatpush3.bf16.msra.mxu0 %v393_v9  ;;  %371 = vmatpush3.bf16.msra.mxu1 %v401_v15 }
  0x4e   :  { %352 = vmatprep.subr.bf16.mxu0 %v503_v0  ;;  %372 = vmatprep.subr.bf16.mxu1 %v503_v0 }
  0x51   :  { %353 = vmatpush3.bf16.msra.mxu0 %v394_v11  ;;  %373 = vmatpush3.bf16.msra.mxu1 %v402_v17 }
  0x52   :  { %354 = vmatprep.subr.bf16.mxu0 %v503_v0  ;;  %374 = vmatprep.subr.bf16.mxu1 %v503_v0 }
  0x55   :  { %355 = vmatpush3.bf16.msra.mxu0 %v395_v13  ;;  %375 = vmatpush3.bf16.msra.mxu1 %v403_v18 }
  0x58   :  { %357 = vmatmul.mubr.bf16.vlgmr.msra.gmra.mrb[0].mxu0 %v79_v16 }
 0x12b   :  { %v168_v20 = vpop.f32.mrb[0].mxu0 }
 0x12c   :  { %v169_v21 = vadd.f32 %v304_v19, %v168_v20  ;;  %v358_v22 = vpop.f32.mrb[1].mxu0 }
 0x12d   :  { %v171_v23 = vpop.f32.mrb[2].mxu0 }
 0x12e   :  { %v174_v24 = vmax.f32 %v169_v21, 0.0  ;;  %v359_v25 = vpop.f32.mrb[3].mxu0 }
 0x130   :  { %v192_v26 = vpack.c.bf16 %v174_v24, %v174_v24 }
 0x132   :  { %377 = vmatmul.mubr.bf16.vlgmr.msra.gmra.mrb[0].mxu1 %v192_v26 }
 0x205   :  { %v281_v28 = vpop.f32.mrb[0].mxu1 }
 0x206   :  { %v282_v29 = vadd.f32 %v313_v27, %v281_v28  ;;  %v378_v30 = vpop.f32.mrb[1].mxu1 }
 0x207   :  { %v284_v31 = vpop.f32.mrb[2].mxu1 }
 0x208   :  { %287 = vst [vmem:[#allocation8] sm:$0xff] %v282_v29  ;;  %v379_v32 = vpop.f32.mrb[3].mxu1 }
 0x209   :  { %481 = shalt.err (!%p478_p0)
}
 0x20a   :  { %s482_s4 = scalar_lea.hbm %s601_s5, 128 }
 0x20b   :  { %p483_p1 = scmp.ne.s32.totalorder %s601_s5, %s482_s4  ;;  %p486_p2 = scmp.lt.u32.totalorder %s482_s4, %s601_s5 }
 0x20d   :  { %p488_p3 = pnand %p486_p2, %p483_p1 }
 0x20f   :  { %491 = shalt.err (!%p488_p3)
}
 0x210   :  { %297 = dma.vmem_to_hbm [thread:$0]  %s295_s8, 128, %s601_s5, [#allocation4]  }
 0x211   :  { %496 = dma.done.wait [#allocation4], 128  }
 0x212   :  { %497 = vsyncadd [#allocation4], 4294967168 }
 0x213   :  { %301 = vsyncpa [#allocation3], 1 }
 0x214   :  { %302 = vsyncpa [#allocation6], 1 }
 0x215   :  { %303 = vsyncpa [#allocation4], 1 }

</bundles_post_ra>
